<compile_context>
chip_gen: v7x
topology: tpu7x:2x2x1
jax: 0.10.0
libtpu: 0.0.40
codegen_flags: <defaults>
</compile_context>

<pallas_src>
import functools
import math

import jax
import jax.numpy as jnp
from jax import lax
from jax.experimental import pallas as pl
from jax.experimental.pallas import tpu as pltpu

_LANES = 1024          # lane-dense slab width (multiple of 128)
_MAX_ROW_BLOCK = 128   # max tile rows -> 512 KiB f32 per input block
_NCORES = 2            # leading "parallel" grid axis (v7x megacore; fine on 1-TC chips)


def _hinge_sum_kernel(x_ref, o_ref, acc_ref, *, positive: bool):
    """Accumulate sum(relu(1 - x)) (positive) or sum(relu(x + 1)) over row tiles."""
    i = pl.program_id(1)

    @pl.when(i == 0)
    def _():
        acc_ref[...] = jnp.zeros_like(acc_ref)

    x = x_ref[...].astype(jnp.float32)
    if positive:                             # sign is a trace-time constant
        h = jnp.maximum(1.0 - x, 0.0)        # relu(1 - x)
    else:
        h = jnp.maximum(x + 1.0, 0.0)        # relu(x + 1)
    acc_ref[...] += h                        # pure VPU; no per-step cross-lane reduce

    @pl.when(i == pl.num_programs(1) - 1)
    def _():
        s = jnp.sum(acc_ref[...], axis=1, keepdims=True)   # (rows, 1)
        s = jnp.sum(s, axis=0, keepdims=True)               # (1, 1)
        row = lax.broadcasted_iota(jnp.int32, (1, 8, 128), 1)
        col = lax.broadcasted_iota(jnp.int32, (1, 8, 128), 2)
        # partial sum in lane (0,0) of this core's output block, zeros elsewhere
        o_ref[...] = jnp.where((row == 0) & (col == 0), s[0, 0], 0.0)


def _hinge_sum(x, *, positive: bool):
    """Sum over all elements of relu(1 - x) or relu(x + 1), computed in Pallas."""
    n = x.size
    rows = max(1, math.ceil(n / _LANES))
    row_block = min(_MAX_ROW_BLOCK, math.ceil(rows / _NCORES))
    row_block = max(8, 8 * math.ceil(row_block / 8))            # multiple of 8
    blocks_per_core = max(1, math.ceil(rows / (_NCORES * row_block)))
    padded_rows = _NCORES * blocks_per_core * row_block
    padded = padded_rows * _LANES

    flat = x.reshape(-1)
    if padded != n:
        # pad value chosen so the hinge of the padding is exactly 0
        pad_val = 2.0 if positive else -2.0
        flat = jnp.pad(flat, (0, padded - n), constant_values=pad_val)
    slab = flat.reshape(padded_rows, _LANES)

    kernel = functools.partial(_hinge_sum_kernel, positive=positive)
    partials = pl.pallas_call(
        kernel,
        out_shape=jax.ShapeDtypeStruct((_NCORES, 8, 128), jnp.float32),
        grid_spec=pltpu.PrefetchScalarGridSpec(
            num_scalar_prefetch=0,
            grid=(_NCORES, blocks_per_core),
            in_specs=[
                pl.BlockSpec((row_block, _LANES),
                             lambda c, i, bpc=blocks_per_core: (c * bpc + i, 0)),
            ],
            out_specs=pl.BlockSpec((1, 8, 128), lambda c, i: (c, 0, 0)),
            scratch_shapes=[pltpu.VMEM((row_block, _LANES), jnp.float32)],
        ),
        compiler_params=pltpu.CompilerParams(
            dimension_semantics=("parallel", "arbitrary")),
    )(slab)
    return jnp.sum(partials)   # only lane (0,0) of each core's block is non-zero


def discriminator_loss(discriminator_source_tensors, discriminator_output_tensors):
    """Matches DiscriminatorLoss.forward: hinge loss over two lists of NCHW tensors."""
    # relu(1 - x).mean(dim=[1,2,3]) then mean over batch == total_sum / numel
    positive_means = [
        _hinge_sum(t, positive=True) / jnp.float32(t.size)
        for t in discriminator_source_tensors
    ]
    negative_means = [
        _hinge_sum(t, positive=False) / jnp.float32(t.size)
        for t in discriminator_output_tensors
    ]
    positive_loss = jnp.mean(jnp.stack(positive_means))
    negative_loss = jnp.mean(jnp.stack(negative_means))
    return (positive_loss + negative_loss) * 0.5


if __name__ == "__main__":
    key = jax.random.PRNGKey(0)
    k1, k2, k3, k4 = jax.random.split(key, 4)

    # multi-scale discriminator feature maps (B, C, H, W)
    discriminator_source_tensors = [
        jax.random.normal(k1, (2, 4, 16, 16), dtype=jnp.float32),
        jax.random.normal(k2, (2, 4, 32, 32), dtype=jnp.float32),
    ]
    discriminator_output_tensors = [
        jax.random.normal(k3, (2, 4, 16, 16), dtype=jnp.float32),
        jax.random.normal(k4, (2, 4, 32, 32), dtype=jnp.float32),
    ]

    loss = discriminator_loss(discriminator_source_tensors,
                              discriminator_output_tensors)
    loss = jax.block_until_ready(loss)

    # pure-JAX reference (same math as the PyTorch module)
    pos = jnp.stack([jnp.mean(jax.nn.relu(1.0 - t), axis=(1, 2, 3))
                     for t in discriminator_source_tensors])
    neg = jnp.stack([jnp.mean(jax.nn.relu(t + 1.0), axis=(1, 2, 3))
                     for t in discriminator_output_tensors])
    ref = (jnp.mean(pos) + jnp.mean(neg)) * 0.5

    assert jnp.allclose(loss, ref, rtol=1e-5, atol=1e-6), (float(loss), float(ref))
    print("KERNEL_OK")
</pallas_src>

<mosaic_0001>
module attributes {stable_mosaic.version = 11 : i64} {
  func.func @_hinge_sum_kernel(%arg0: i32, %arg1: i32, %arg2: memref<8x1024xf32, #tpu.memory_space<vmem>>, %arg3: memref<1x8x128xf32, #tpu.memory_space<vmem>>, %arg4: memref<8x1024xf32, #tpu.memory_space<vmem>>) attributes {dimension_semantics = [#tpu.dimension_semantics<parallel>, #tpu.dimension_semantics<arbitrary>], iteration_bounds = array<i64: 2, 1>, scalar_prefetch = 0 : i64, scratch_operands = 1 : i64, tpu.core_type = #tpu.core_type<tc>, window_params = [{transform_indices = @transform_0, window_bounds = array<i64: 8, 1024>}, {transform_indices = @transform_1, window_bounds = array<i64: 1, 8, 128>}]} {
    %c0_i32 = arith.constant 0 : i32
    %0 = arith.cmpi eq, %arg1, %c0_i32 : i32
    %1 = arith.extui %0 : i1 to i32
    %c0_i32_0 = arith.constant 0 : i32
    %2 = arith.cmpi ne, %1, %c0_i32_0 : i32
    scf.if %2 {
      %cst_9 = arith.constant 0.000000e+00 : f32
      %14 = vector.broadcast %cst_9 : f32 to vector<8x1024xf32>
      %c0_10 = arith.constant 0 : index
      %c0_11 = arith.constant 0 : index
      %15 = vector.load %arg4[%c0_10, %c0_11] : memref<8x1024xf32, #tpu.memory_space<vmem>>, vector<8x1024xf32>
      tpu.vector_store %arg4[%c0_10, %c0_11], %14 {strides = array<i32>} : memref<8x1024xf32, #tpu.memory_space<vmem>>, vector<8x1024xf32>,
    } else {
    }
    %c0 = arith.constant 0 : index
    %c0_1 = arith.constant 0 : index
    %3 = vector.load %arg2[%c0, %c0_1] : memref<8x1024xf32, #tpu.memory_space<vmem>>, vector<8x1024xf32>
    %cst = arith.constant 1.000000e+00 : f32
    %4 = vector.broadcast %cst : f32 to vector<8x1024xf32>
    %5 = arith.subf %4, %3 : vector<8x1024xf32>
    %cst_2 = arith.constant 0.000000e+00 : f32
    %6 = vector.broadcast %cst_2 : f32 to vector<8x1024xf32>
    %7 = arith.maximumf %5, %6 : vector<8x1024xf32>
    %c0_3 = arith.constant 0 : index
    %c0_4 = arith.constant 0 : index
    %8 = vector.load %arg4[%c0_3, %c0_4] : memref<8x1024xf32, #tpu.memory_space<vmem>>, vector<8x1024xf32>
    %9 = arith.addf %8, %7 : vector<8x1024xf32>
    %c0_5 = arith.constant 0 : index
    %c0_6 = arith.constant 0 : index
    %10 = vector.load %arg4[%c0_5, %c0_6] : memref<8x1024xf32, #tpu.memory_space<vmem>>, vector<8x1024xf32>
    tpu.vector_store %arg4[%c0_5, %c0_6], %9 {strides = array<i32>} : memref<8x1024xf32, #tpu.memory_space<vmem>>, vector<8x1024xf32>,
    %c0_i32_7 = arith.constant 0 : i32
    %11 = arith.cmpi eq, %arg1, %c0_i32_7 : i32
    %12 = arith.extui %11 : i1 to i32
    %c0_i32_8 = arith.constant 0 : i32
    %13 = arith.cmpi ne, %12, %c0_i32_8 : i32
    scf.if %13 {
      %c0_9 = arith.constant 0 : index
      %c0_10 = arith.constant 0 : index
      %14 = vector.load %arg4[%c0_9, %c0_10] : memref<8x1024xf32, #tpu.memory_space<vmem>>, vector<8x1024xf32>
      %cst_11 = arith.constant dense<0.000000e+00> : vector<8xf32>
      %15 = vector.multi_reduction <add>, %14, %cst_11 [1] : vector<8x1024xf32> to vector<8xf32>
      %16 = vector.shape_cast %15 : vector<8xf32> to vector<8x1xf32>
      %cst_12 = arith.constant dense<0.000000e+00> : vector<1xf32>
      %17 = vector.multi_reduction <add>, %16, %cst_12 [0] : vector<8x1xf32> to vector<1xf32>
      %18 = vector.shape_cast %17 : vector<1xf32> to vector<1x1xf32>
      %19 = tpu.iota {dimensions = array<i32: 1>} : vector<1x8x128xi32>
      %20 = tpu.iota {dimensions = array<i32: 2>} : vector<1x8x128xi32>
      %c0_i32_13 = arith.constant 0 : i32
      %21 = vector.broadcast %c0_i32_13 : i32 to vector<1x8x128xi32>
      %22 = arith.cmpi eq, %19, %21 : vector<1x8x128xi32>
      %c0_i32_14 = arith.constant 0 : i32
      %23 = vector.broadcast %c0_i32_14 : i32 to vector<1x8x128xi32>
      %24 = arith.cmpi eq, %20, %23 : vector<1x8x128xi32>
      %25 = arith.andi %22, %24 : vector<1x8x128xi1>
      %26 = vector.extract %18[0, 0] : f32 from vector<1x1xf32>
      %cst_15 = arith.constant 0.000000e+00 : f32
      %27 = vector.broadcast %26 : f32 to vector<1x8x128xf32>
      %28 = vector.broadcast %cst_15 : f32 to vector<1x8x128xf32>
      %29 = arith.select %25, %27, %28 : vector<1x8x128xi1>, vector<1x8x128xf32>
      %c0_16 = arith.constant 0 : index
      %c0_17 = arith.constant 0 : index
      %c0_18 = arith.constant 0 : index
      %30 = vector.load %arg3[%c0_16, %c0_17, %c0_18] : memref<1x8x128xf32, #tpu.memory_space<vmem>>, vector<1x8x128xf32>
      tpu.vector_store %arg3[%c0_16, %c0_17, %c0_18], %29 {strides = array<i32>} : memref<1x8x128xf32, #tpu.memory_space<vmem>>, vector<1x8x128xf32>,
    } else {
    }
    return
  }
  func.func @transform_0(%arg0: i32, %arg1: i32) -> (i32, i32) {
    %c1_i32 = arith.constant 1 : i32
    %0 = arith.muli %arg0, %c1_i32 : i32
    %1 = arith.addi %0, %arg1 : i32
    %c0_i32 = arith.constant 0 : i32
    %c0_i32_0 = arith.constant 0 : i32
    return %1, %c0_i32 : i32, i32
  }
  func.func @transform_1(%arg0: i32, %arg1: i32) -> (i32, i32, i32) {
    %c0_i32 = arith.constant 0 : i32
    %c0_i32_0 = arith.constant 0 : i32
    %c0_i32_1 = arith.constant 0 : i32
    return %arg0, %c0_i32, %c0_i32_0 : i32, i32, i32
  }
}

</mosaic_0001>

<bundles_post_ra>
// kernel: tpu_custom_call.1
= control target key start
LH: loop header
LB: loop body
LE: loop exit
PB: predicated region body
PF: predicated region fallthrough
CT: control target
= control target key end

     0   :  { %6 = vsyncpa [#allocation4], 0  ;;  %s717_s0 = inlined_call_operand.hbm [shape: f32[16,1024], index: 0, kind: input, shape index: {}]   ;;  %s718_s1 = inlined_call_operand.hbm [shape: f32[2,8,128], index: 1, kind: output, shape index: {}]  }
   0x1   :  { %8 = vsyncpa [#allocation4 + $0x1], 0 }
   0x2   :  { %9 = vsyncpa [#allocation5], 0 }
   0x3   :  { %11 = vsyncpa [#allocation5 + $0x1], 0  ;;  %s544_s6 = smov 0   ;;  %s546_s7 = smov 0  }
   0x4   :  { %s548_s8 = smov 0   ;;  %s550_s9 = smov 0  }
   0x5   :  { %s552_s10 = smov 0   ;;  %s554_s11 = smov 0  }
   0x6 LB: > { %s339_s12 = sadd.s32 4294967295, %s530_s11   ;;  %s340_s13 = sadd.s32 4294967294, %s530_s11   ;;  %s530_s11 = sphi %s554_s11, %s17_s11   ;;  %s526_s10 = sphi %s552_s10, %s734_s10   ;;  %s522_s9 = sphi %s550_s9, %s733_s9   ;;  %s518_s8 = sphi %s548_s8, %s732_s8   ;;  %s514_s7 = sphi %s546_s7, %s731_s7   ;;  %s510_s6 = sphi %s544_s6, %s730_s6  }
   0x7   : > { %s29_s14 = sadd.s32 1, %s526_s10  ;;  %s38_s15 = sadd.s32 1, %s518_s8 }
   0x8   : > { %p31_p0 = scmp.ge.s32.totalorder %s29_s14, 2  ;;  %p45_p1 = scmp.ne.s32.totalorder %s518_s8, %s514_s7 }
   0x9   : > { %p46_p2 = scmp.eq.s32.totalorder %s530_s11, 0  ;;  %p51_p3 = scmp.ne.s32.totalorder %s514_s7, %s510_s6 }
   0xa   : > { %s736_s14 = smov (%p31_p0, %s29_s14), 0  ;;  %p52_p5 = scmp.eq.s32.totalorder %s339_s12, 0 }
   0xb   : > { %p585_p4 = por %p46_p2, %p45_p1  ;;  %s35_s17 = ssub.s32 %s526_s10, %s736_s14 }
   0xc   : > { %p75_p6 = scmp.eq.s32.totalorder %s339_s12, 1  ;;  %p36_p7 = scmp.eq.s32.totalorder %s35_s17, 0 }
   0xd   : > { %p591_p8 = por %p52_p5, %p51_p3  ;;  %p81_p10 = scmp.eq.s32.totalorder %s340_s13, 1 }
   0xe   : > { %p595_p9 = por %p75_p6, %p45_p1  ;;  %p368_p13 = scmp.lt.s32.totalorder %s530_s11, 2 }
   0xf   : > { %s600_s20 = scalar_select %p36_p7, %s518_s8, %s38_s15  }
  0x10   : > { %s722_s19 = scalar_select %p595_p9, 1, 0 }
  0x11   : > { %p602_p11 = por %p81_p10, %p51_p3  ;;  %s101_s22 = sand.u32 1, %s518_s8  }
  0x12   : > { %s343_s23 = sshll.u32 %s101_s22, 6  ;;  %s353_s24 = sshll.u32 %s526_s10, 10 }
  0x13   : > { %s723_s21 = scalar_select %p602_p11, 1, 0 }
  0x14   : > { %s613_s27 = scalar_lea.hbm %s717_s0, %s353_s24  ;;  %s105_s28 = scalar_lea.vmem [#allocation3], %s343_s23 }
  0x15   : > { %s114_s29 = sshll.u32 %s105_s28, 4  ;;  %p619_p0 = pnand %p368_p13, %p585_p4  ;;  %s615_s29 = int_to_ptr.vmem [resolvable:$true] %s114_s29 }
  0x16   : > { %s102_s2 = scalar_lea.sflag [#allocation4], %s101_s22  ;;  %s418_s3 = scalar_lea.hbm %s613_s27, 1024 }
  0x17   : > { %p419_p3 = scmp.ne.s32.totalorder %s613_s27, %s418_s3  ;;  %p420_p5 = pneg %p619_p0 }
  0x18   : > { %s423_s12 = scalar_lea.hbm %s717_s0, 2048  ;;  %p424_p4 = scmp.lt.u32.totalorder %s613_s27, %s717_s0 }
  0x19   : > { %p421_p6 = pnand %p420_p5, %p419_p3  ;;  %p425_p10 = scmp.lt.u32.totalorder %s423_s12, %s418_s3 }
  0x1a   : > { %p427_p12 = scmp.lt.u32.totalorder %s418_s3, %s613_s27 }
  0x1b   : > { %p422_p7 = pneg %p421_p6  ;;  %p426_p13 = por %p425_p10, %p424_p4 }
  0x1d   : > { %p428_p1 = por %p427_p12, %p426_p13 }
  0x1f   : > { %p429_p2 = pnand %p428_p1, %p422_p7 }
  0x21   : > { %432 = shalt.err (!%p429_p2)
}
  0x22   : > { %s433_s16 = scalar_lea.vmem %s615_s29, 1024  ;;  %s532_s17 = smov [#allocation3]  }
  0x23   : > { %p434_p3 = scmp.ne.s32.totalorder %s615_s29, %s433_s16  ;;  %s438_s22 = sshll.u32 %s532_s17, 4  ;;  %s439_s22 = int_to_ptr.vmem [resolvable:$false] %s438_s22 }
  0x24   : > { %s440_s23 = scalar_lea.vmem %s439_s22, 2048  ;;  %p441_p9 = scmp.lt.s32.totalorder %s615_s29, %s439_s22 }
  0x25   : > { %p436_p6 = pnand %p434_p3, %p420_p5  ;;  %p442_p4 = scmp.lt.s32.totalorder %s440_s23, %s433_s16 }
  0x27   : > { %p437_p11 = pneg %p436_p6  ;;  %p443_p10 = por %p442_p4, %p441_p9 }
  0x29   : > { %p444_p12 = pnand %p443_p10, %p437_p11 }
  0x2b   : > { %447 = shalt.err (!%p444_p12)
}
  0x2c   : > { %363 = dma.hbm_to_vmem [thread:$0]  (!%p619_p0), %s613_s27, 1024, %s615_s29, %s102_s2  }
  0x2d   : > { %p725_p1 = scmp.lt.s32.totalorder %s530_s11, 3  ;;  %p726_p2 = scmp.ge.s32.totalorder %s530_s11, 1 }
  0x2f   : > { %p120_p5 = pnand %p726_p2, %p725_p1 }
  0x30   : > { %s655_s24 = sand.u32 (!%p120_p5), 1, %s514_s7  }
  0x31   : > { %123 = sbr.rel (%p120_p5) target bundleno = 296 (0x128), region = 24  ;;  %s347_s25 = sshll.u32 (!%p120_p5), %s655_s24, 6 }
  0x32   : > { %s126_s26 = scalar_lea.sflag (!%p120_p5), [#allocation4], %s655_s24  ;;  %s129_s28 = scalar_lea.vmem (!%p120_p5), [#allocation3], %s347_s25 }
  0x38   : > { %501 = dma.done.wait (%p591_p8), %s126_s26, 1024  }
  0x39   : > { %503 = vsyncadd (%p591_p8), %s126_s26, 4294966272  ;;  %v161_v0 = vld [vmem:[%s129_s28] sm:$0xff]  ;;  %v162_v1 = vld [vmem:[%s129_s28 + $0x8] sm:$0xff]  ;;  %v235_v38 = vlaneseq  ;;  %s348_s18 = sshll.u32 %s655_s24, 3  ;;  %s350_s27 = sshll.u32 %s522_s9, 7 }
  0x3a   : > { %v163_v2 = vld [vmem:[%s129_s28 + $0x10] sm:$0xff]  ;;  %v164_v3 = vld [vmem:[%s129_s28 + $0x18] sm:$0xff]  ;;  %v165_v4 = vld [vmem:[%s129_s28 + $0x20] sm:$0xff]  ;;  %v169_v5 = vsub.f32 1.0, %v161_v0  ;;  %v170_v6 = vsub.f32 1.0, %v162_v1  ;;  %s147_s29 = scalar_lea.vmem [#allocation6], %s348_s18  ;;  %s668_s5 = scalar_lea.hbm %s718_s1, %s350_s27 }
  0x3b   : > { %v171_v7 = vsub.f32 1.0, %v163_v2  ;;  %v166_v8 = vld [vmem:[%s129_s28 + $0x28] sm:$0xff]  ;;  %v172_v9 = vsub.f32 1.0, %v164_v3  ;;  %v173_v10 = vsub.f32 1.0, %v165_v4  ;;  %v167_v13 = vld [vmem:[%s129_s28 + $0x30] sm:$0xff]  ;;  %v168_v18 = vld [vmem:[%s129_s28 + $0x38] sm:$0xff] }
  0x3c   : > { %v177_v11 = vmax.f32 %v169_v5, 0.0  ;;  %v178_v12 = vmax.f32 %v170_v6, 0.0  ;;  %v174_v15 = vsub.f32 1.0, %v166_v8  ;;  %v175_v19 = vsub.f32 1.0, %v167_v13  ;;  %s260_s30 = sshll.u32 %s147_s29, 4  ;;  %s247_s12 = scalar_lea.sflag [#allocation5], %s655_s24  ;;  %s670_s30 = int_to_ptr.vmem [resolvable:$true] %s260_s30 }
  0x3d   : > { %v179_v14 = vmax.f32 %v171_v7, 0.0  ;;  %v180_v16 = vmax.f32 %v172_v9, 0.0  ;;  %v181_v20 = vmax.f32 %v173_v10, 0.0  ;;  %v176_v22 = vsub.f32 1.0, %v168_v18  ;;  %s448_s13 = scalar_lea.vmem %s670_s30, 128  ;;  %p727_p9 = scmp.ne.s32.totalorder %s722_s19, 0 }
  0x3e   : > { %v220_v17 = vadd.f32 %v178_v12, %v177_v11  ;;  %v182_v23 = vmax.f32 %v174_v15, 0.0  ;;  %v183_v25 = vmax.f32 %v175_v19, 0.0  ;;  %v236_v39 = vshrl.u32 %v235_v38, 7  ;;  %p449_p8 = scmp.ne.s32.totalorder %s670_s30, %s448_s13  ;;  %s533_s9 = smov [#allocation6]  }
  0x3f   : > { %v184_v27 = vmax.f32 %v176_v22, 0.0  ;;  %v238_v40 = vand.u32 127, %v235_v38  ;;  %s452_s15 = sshll.u32 %s533_s9, 4  ;;  %s453_s15 = int_to_ptr.vmem [resolvable:$false] %s452_s15 }
  0x40   : > { %v221_v21 = vadd.f32 %v220_v17, %v179_v14  ;;  %vm239_vm0 = vcmp.eq.s32.totalorder %v236_v39, 0  ;;  %p450_p11 = pnand %p449_p8, %p727_p9  ;;  %s454_s16 = scalar_lea.vmem %s453_s15, 256 }
  0x41   : > { %vm240_vm1 = vcmp.eq.s32.totalorder %v238_v40, 0  ;;  %p455_p7 = scmp.lt.s32.totalorder %s670_s30, %s453_s15  ;;  %p456_p13 = scmp.lt.s32.totalorder %s454_s16, %s448_s13 }
  0x42   : > { %v222_v24 = vadd.f32 %v221_v21, %v180_v16  ;;  %vm241_vm2 = vmand %vm239_vm0, %vm240_vm1  ;;  %p451_p0 = pneg %p450_p11 }
  0x43   : > { %p457_p3 = por %p456_p13, %p455_p7 }
  0x44   : > { %v223_v26 = vadd.f32 %v222_v24, %v181_v20 }
  0x45   : > { %p458_p6 = pnand %p457_p3, %p451_p0 }
  0x46   : > { %v224_v28 = vadd.f32 %v223_v26, %v182_v23 }
  0x48   : > { %v225_v29 = vadd.f32 %v224_v28, %v183_v25 }
  0x4a   : > { %v226_v30 = vadd.f32 %v225_v29, %v184_v27 }
  0x4c   : > { %227 = vadd.xlane.f32.xlu0 %v226_v30 }
  0xd9   : > { %v228_v31 = vpop.xlane.xlu0 %227 }
  0xda   : > { %v229_v32 = vrot.slane %v228_v31, 4 }
  0xdc   : > { %v230_v33 = vadd.f32 %v229_v32, %v228_v31 }
  0xde   : > { %v231_v34 = vrot.slane %v230_v33, 2 }
  0xe0   : > { %v232_v35 = vadd.f32 %v231_v34, %v230_v33 }
  0xe2   : > { %v233_v36 = vrot.slane %v232_v35, 1 }
  0xe4   : > { %v234_v37 = vadd.f32 %v233_v36, %v232_v35 }
  0xe6   : > { %354 = vpush %v234_v37 }
 0x117   : > { %s355_s2 = spop %354 }
 0x118   : > { %v243_v41 = vstv %s355_s2 }
 0x119   : > { %v244_v42 = vsel %vm241_vm2, %v243_v41, 0.0 }
 0x11a   : > { %245 = vst [vmem:[%s147_s29] sm:$0xff] %v244_v42 }
 0x11b   : > { %461 = shalt.err (!%p458_p6)
}
 0x11c   : > { %s462_s17 = scalar_lea.hbm %s668_s5, 128  ;;  %s466_s24 = scalar_lea.hbm %s718_s1, 256 }
 0x11d   : > { %p463_p4 = scmp.ne.s32.totalorder %s668_s5, %s462_s17  ;;  %p467_p1 = scmp.lt.u32.totalorder %s668_s5, %s718_s1 }
 0x11e   : > { %p468_p2 = scmp.lt.u32.totalorder %s466_s24, %s462_s17  ;;  %p470_p8 = scmp.lt.u32.totalorder %s462_s17, %s668_s5 }
 0x11f   : > { %p464_p10 = pnand %p463_p4, %p727_p9 }
 0x120   : > { %p469_p5 = por %p468_p2, %p467_p1 }
 0x121   : > { %p465_p12 = pneg %p464_p10 }
 0x122   : > { %p471_p11 = por %p470_p8, %p469_p5 }
 0x124   : > { %p472_p0 = pnand %p471_p11, %p465_p12 }
 0x126   : > { %475 = shalt.err (!%p472_p0)
}
 0x127   : > { %358 = dma.vmem_to_hbm [thread:$0]  (%p727_p9), %s670_s30, 128, %s668_s5, %s247_s12  }
 0x128 PF: > { %s272_s28 = sand.u32 1, %s510_s6   ;;  %p728_p7 = scmp.ne.s32.totalorder %s723_s21, 0 }
 0x129   : > { %p729_p13 = scmp.ge.s32.totalorder %s530_s11, 2  ;;  %s273_s18 = scalar_lea.sflag [#allocation5], %s272_s28 }
 0x12b   : > { %p365_p3 = pnand %p729_p13, %p728_p7 }
 0x12d   : > { %505 = dma.done.wait (!%p365_p3), %s273_s18, 128  }
 0x12e   : > { %507 = vsyncadd (!%p365_p3), %s273_s18, 4294967168  ;;  %s17_s11 = sadd.s32 1, %s530_s11   ;;  %s730_s6 = smov %s514_s7 }
 0x12f   : > { %p14_p6 = scmp.ge.s32.totalorder %s17_s11, 4   ;;  %s731_s7 = smov %s518_s8 }
 0x130   : > { %s732_s8 = smov %s600_s20  ;;  %s733_s9 = smov %s526_s10 }
 0x131   : > { %s734_s10 = smov %s736_s14  ;;  %16 = sbr.rel (!%p14_p6) target bundleno = 6 (0x6), region = 77 }
 0x138   :  { %278 = vsyncpa [#allocation4], 1 }
 0x139   :  { %280 = vsyncpa [#allocation4 + $0x1], 1 }
 0x13a   :  { %281 = vsyncpa [#allocation5], 1 }
 0x13b   :  { %283 = vsyncpa [#allocation5 + $0x1], 1 }

</bundles_post_ra>
